<compile_context>
chip_gen: v7x
topology: tpu7x:2x2x1
jax: 0.10.0
libtpu: 0.0.40
codegen_flags: <defaults>
</compile_context>

<pallas_src>
import functools

import jax
import jax.numpy as jnp
from jax import lax
from jax.experimental import pallas as pl
from jax.experimental.pallas import tpu as pltpu

BINS = 10
ALPHA = 0.5
LANE = 128
SUBLANE = 8
CHUNK = SUBLANE * LANE          # elements per (8,128) vreg
NCORES = 2                      # leading "parallel" grid axis (v7x megacore)


def _ghm_partials_kernel(x_ref, t_ref, cnt_ref, ls_ref, *,
                         bins, n_elem, tm, gpc):
    """Accumulate per-bin element counts and per-bin BCE-loss sums.

    x_ref, t_ref : (tm, 128) logit / target tiles.
    cnt_ref, ls_ref : (1, bins, 8, 128) resident accumulators (one row of the
        (NCORES, bins, 8, 128) outputs, selected by the parallel core axis).
    """
    c = pl.program_id(0)            # parallel (core) axis
    i = pl.program_id(1)            # arbitrary (reduction) axis

    @pl.when(i == 0)
    def _init():
        cnt_ref[...] = jnp.zeros_like(cnt_ref)
        ls_ref[...] = jnp.zeros_like(ls_ref)

    # Logical (unclamped) flat element offset of this tile.  Overhang blocks
    # created by the per-core round-up (their DMA index is clamped in the
    # index_map) get tile_start >= n_elem and therefore contribute nothing.
    tile_start = (c * gpc + i) * (tm * LANE)
    rem = n_elem - tile_start                       # valid elems left in tile

    # Flat 0..1023 index of each element inside one (8,128) chunk.
    lin = (lax.broadcasted_iota(jnp.int32, (SUBLANE, LANE), 0) * LANE
           + lax.broadcasted_iota(jnp.int32, (SUBLANE, LANE), 1))

    gscale = jnp.float32(bins - 0.0001)
    nsub = tm // SUBLANE

    def chunk(j, carry):
        cnts, sums = carry
        r0 = pl.multiple_of(j * SUBLANE, SUBLANE)
        xs = x_ref[pl.ds(r0, SUBLANE), :].astype(jnp.float32)
        ts = t_ref[pl.ds(r0, SUBLANE), :].astype(jnp.float32)

        # Fused transcendental chain: one exp, one log1p, one divide.
        e = jnp.exp(-jnp.abs(xs))
        # Exact divide keeps bin boundaries bit-consistent with the reference;
        # pl.reciprocal(..., approx=True) is faster (EUP) but can flip
        # elements sitting exactly on a bin boundary.
        sig = jnp.where(xs >= 0.0, 1.0, e) / (1.0 + e)          # sigmoid(x)
        g = jnp.abs(sig - ts)                                   # |dL/dx|
        loss = jnp.maximum(xs, 0.0) - xs * ts + jnp.log1p(e)    # BCE w/ logits
        bidx = (g * gscale).astype(jnp.int32)                   # trunc==floor

        # Ragged / padded tail masking: 1 compare + 2 selects per vreg (also
        # neutralises fully out-of-range overhang tiles).
        valid = lin < (rem - j * CHUNK)
        bidx = jnp.where(valid, bidx, -1)
        loss = jnp.where(valid, loss, 0.0)

        new_cnts, new_sums = [], []
        for b in range(bins):
            eq = bidx == b
            new_cnts.append(cnts[b] + jnp.where(eq, 1.0, 0.0))
            new_sums.append(sums[b] + jnp.where(eq, loss, 0.0))
        return tuple(new_cnts), tuple(new_sums)

    zero = jnp.zeros((SUBLANE, LANE), jnp.float32)
    init = (tuple(zero for _ in range(bins)),
            tuple(zero for _ in range(bins)))
    cnts, sums = lax.fori_loop(0, nsub, chunk, init)

    # One VMEM read-modify-write per bin per tile (negligible vs chunk work).
    for b in range(bins):
        cnt_ref[0, b] += cnts[b]
        ls_ref[0, b] += sums[b]


def ghm_partial_sums(x, target, *, bins=BINS, tm=1024):
    """Single streaming pass: returns per-bin (counts, loss_sums), each (bins,)."""
    assert x.ndim == 2 and x.shape == target.shape
    n_elem = x.shape[0] * x.shape[1]

    # Lane-dense [rows, 128] view.  Pad (a copy) only when unavoidable
    # (n_elem not a multiple of 128, or fewer than 8 rows).
    rows = -(-n_elem // LANE)
    rows = max(rows, SUBLANE)
    pad = rows * LANE - n_elem
    xf = x.reshape(-1)
    tf = target.reshape(-1)
    if pad:
        xf = jnp.pad(xf, (0, pad))
        tf = jnp.pad(tf, (0, pad))
    x2 = xf.reshape(rows, LANE)
    t2 = tf.reshape(rows, LANE)

    tm_eff = min(tm, (rows // SUBLANE) * SUBLANE)   # multiple of 8, >= 8
    nblocks = -(-rows // tm_eff)                    # last block may be ragged
    gpc = -(-nblocks // NCORES)                     # row blocks per core

    kernel = functools.partial(_ghm_partials_kernel, bins=bins,
                               n_elem=n_elem, tm=tm_eff, gpc=gpc)

    def in_map(c, i):
        # Clamp so the DMA never walks past the array; overhang blocks are
        # neutralised by the in-kernel validity mask (logical index >= n_elem).
        return (jnp.minimum(c * gpc + i, nblocks - 1), 0)

    out_spec = pl.BlockSpec((1, bins, SUBLANE, LANE), lambda c, i: (c, 0, 0, 0))

    # (v7x-only extras not enabled here: pipeline_mode=pl.Buffered(3) on the
    #  input specs and bf16 HBM storage for x/target.)
    cnt_raw, ls_raw = pl.pallas_call(
        kernel,
        grid=(NCORES, gpc),
        out_shape=(
            jax.ShapeDtypeStruct((NCORES, bins, SUBLANE, LANE), jnp.float32),
            jax.ShapeDtypeStruct((NCORES, bins, SUBLANE, LANE), jnp.float32),
        ),
        in_specs=[
            pl.BlockSpec((tm_eff, LANE), in_map),
            pl.BlockSpec((tm_eff, LANE), in_map),
        ],
        out_specs=(out_spec, out_spec),
        compiler_params=pltpu.CompilerParams(
            dimension_semantics=("parallel", "arbitrary"),
            vmem_limit_bytes=32 * 1024 * 1024,
        ),
    )(x2, t2)

    counts = jnp.sum(cnt_raw, axis=(0, 2, 3))       # (bins,)
    loss_sums = jnp.sum(ls_raw, axis=(0, 2, 3))     # (bins,)
    return counts, loss_sums


def ghm_loss_pallas(x, target, last_bin_count=None, *,
                    bins=BINS, alpha=ALPHA, tm=1024):
    """GHM_Loss forward (GHMC hooks).  Returns (loss_scalar, new_bin_count)."""
    n = x.shape[0] * x.shape[1]
    counts, loss_sums = ghm_partial_sums(x, target, bins=bins, tm=tm)

    # Tiny O(bins) finalize in plain JAX (EMA, nonempty, beta, combine).
    if last_bin_count is None:
        bin_count = counts
    else:
        bin_count = alpha * last_bin_count + (1.0 - alpha) * counts

    nonempty = jnp.sum((bin_count > 0).astype(jnp.float32))
    gd = jnp.maximum(bin_count * nonempty, 0.0001)
    beta = jnp.float32(n) / gd
    loss = jnp.sum(beta * loss_sums) / jnp.float32(n)
    return loss, bin_count


class GHMLossPallas:
    """Stateful wrapper mirroring GHM_Loss (keeps _last_bin_count across calls)."""

    def __init__(self, bins=BINS, alpha=ALPHA, tm=1024):
        self._bins = bins
        self._alpha = alpha
        self._tm = tm
        self._last_bin_count = None

    def __call__(self, x, target):
        loss, new_bc = ghm_loss_pallas(x, target, self._last_bin_count,
                                       bins=self._bins, alpha=self._alpha,
                                       tm=self._tm)
        self._last_bin_count = new_bc
        return loss


def _stable_sigmoid(x):
    e = jnp.exp(-jnp.abs(x))
    return jnp.where(x >= 0.0, 1.0, e) / (1.0 + e)


def _reference(x, target, last_bin_count, bins=BINS, alpha=ALPHA):
    """Pure-JAX replica of the PyTorch forward (GHMC hooks)."""
    g = jnp.abs(_stable_sigmoid(x) - target)
    bin_idx = jnp.floor(g * (bins - 0.0001)).astype(jnp.int32)
    bin_count = jnp.array([jnp.sum(bin_idx == i) for i in range(bins)],
                          jnp.float32)
    if last_bin_count is not None:
        bin_count = alpha * last_bin_count + (1.0 - alpha) * bin_count
    n = x.shape[0] * x.shape[1]
    nonempty = jnp.sum((bin_count > 0).astype(jnp.float32))
    gd = jnp.maximum(bin_count * nonempty, 0.0001)
    beta = n / gd
    w = beta[bin_idx]
    le = jnp.maximum(x, 0.0) - x * target + jnp.log1p(jnp.exp(-jnp.abs(x)))
    return jnp.sum(w * le) / n, bin_count


if __name__ == "__main__":
    key = jax.random.PRNGKey(0)
    kx, kt, kx2, kt2 = jax.random.split(key, 4)

    # --- Test 1: small shape; two calls exercise the stateful EMA path.
    B, C = 8, 32
    x = jax.random.normal(kx, (B, C), jnp.float32)
    t = jax.random.bernoulli(kt, 0.5, (B, C)).astype(jnp.float32)

    mod = GHMLossPallas()
    loss1 = jax.block_until_ready(mod(x, t))
    ref1, ref_bc = _reference(x, t, None)
    loss2 = jax.block_until_ready(mod(x * 0.5, t))
    ref2, _ = _reference(x * 0.5, t, ref_bc)
    assert jnp.allclose(loss1, ref1, rtol=1e-4, atol=1e-5), (loss1, ref1)
    assert jnp.allclose(loss2, ref2, rtol=1e-4, atol=1e-5), (loss2, ref2)

    # --- Test 2: n_elem % 128 == 0 -> pad-free path with a ragged last row
    # block; tm=8 forces a multi-step reduction grid on both "core" slices.
    B2, C2 = 40, 64
    x2 = jax.random.normal(kx2, (B2, C2), jnp.float32)
    t2 = jax.random.bernoulli(kt2, 0.3, (B2, C2)).astype(jnp.float32)
    loss3, bc3 = ghm_loss_pallas(x2, t2, None, tm=8)
    loss3 = jax.block_until_ready(loss3)
    ref3, ref3_bc = _reference(x2, t2, None)
    assert jnp.allclose(loss3, ref3, rtol=1e-4, atol=1e-5), (loss3, ref3)
    assert jnp.allclose(bc3, ref3_bc, atol=1e-3), (bc3, ref3_bc)

    # --- Test 3: default tile size + EMA input on the same data.
    loss4, bc4 = ghm_loss_pallas(x2, t2, ref3_bc)
    loss4 = jax.block_until_ready(loss4)
    ref4, _ = _reference(x2, t2, ref3_bc)
    assert jnp.allclose(loss4, ref4, rtol=1e-4, atol=1e-5), (loss4, ref4)

    # TODO(synk): GHM_Loss._custom_loss/_custom_loss_grad are abstract in the
    # spec; the concrete GHMC hooks (sigmoid grad + BCE-with-logits, 'mean'
    # reduction) are the loss implemented here.
    print("KERNEL_OK")
</pallas_src>

<mosaic_0001>
module attributes {stable_mosaic.version = 11 : i64} {
  func.func @_ghm_partials_kernel(%arg0: i32, %arg1: i32, %arg2: memref<8x128xf32, #tpu.memory_space<vmem>>, %arg3: memref<8x128xf32, #tpu.memory_space<vmem>>, %arg4: memref<1x10x8x128xf32, #tpu.memory_space<vmem>>, %arg5: memref<1x10x8x128xf32, #tpu.memory_space<vmem>>) attributes {dimension_semantics = [#tpu.dimension_semantics<parallel>, #tpu.dimension_semantics<arbitrary>], iteration_bounds = array<i64: 2, 1>, scalar_prefetch = 0 : i64, scratch_operands = 0 : i64, tpu.core_type = #tpu.core_type<tc>, window_params = [{transform_indices = @transform_0, window_bounds = array<i64: 8, 128>}, {transform_indices = @transform_1, window_bounds = array<i64: 8, 128>}, {transform_indices = @transform_2, window_bounds = array<i64: 1, 10, 8, 128>}, {transform_indices = @transform_3, window_bounds = array<i64: 1, 10, 8, 128>}]} {
    %c0_i32 = arith.constant 0 : i32
    %0 = arith.cmpi eq, %arg1, %c0_i32 : i32
    %1 = arith.extui %0 : i1 to i32
    %c0_i32_0 = arith.constant 0 : i32
    %2 = arith.cmpi ne, %1, %c0_i32_0 : i32
    scf.if %2 {
      %cst_196 = arith.constant 0.000000e+00 : f32
      %259 = vector.broadcast %cst_196 : f32 to vector<1x10x8x128xf32>
      %c0_197 = arith.constant 0 : index
      %c0_198 = arith.constant 0 : index
      %c0_199 = arith.constant 0 : index
      %c0_200 = arith.constant 0 : index
      %260 = vector.load %arg4[%c0_197, %c0_198, %c0_199, %c0_200] : memref<1x10x8x128xf32, #tpu.memory_space<vmem>>, vector<1x10x8x128xf32>
      tpu.vector_store %arg4[%c0_197, %c0_198, %c0_199, %c0_200], %259 {strides = array<i32>} : memref<1x10x8x128xf32, #tpu.memory_space<vmem>>, vector<1x10x8x128xf32>,
      %cst_201 = arith.constant 0.000000e+00 : f32
      %261 = vector.broadcast %cst_201 : f32 to vector<1x10x8x128xf32>
      %c0_202 = arith.constant 0 : index
      %c0_203 = arith.constant 0 : index
      %c0_204 = arith.constant 0 : index
      %c0_205 = arith.constant 0 : index
      %262 = vector.load %arg5[%c0_202, %c0_203, %c0_204, %c0_205] : memref<1x10x8x128xf32, #tpu.memory_space<vmem>>, vector<1x10x8x128xf32>
      tpu.vector_store %arg5[%c0_202, %c0_203, %c0_204, %c0_205], %261 {strides = array<i32>} : memref<1x10x8x128xf32, #tpu.memory_space<vmem>>, vector<1x10x8x128xf32>,
    } else {
    }
    %c1_i32 = arith.constant 1 : i32
    %3 = arith.muli %arg0, %c1_i32 : i32
    %4 = arith.addi %3, %arg1 : i32
    %c1024_i32 = arith.constant 1024 : i32
    %5 = arith.muli %4, %c1024_i32 : i32
    %c256_i32 = arith.constant 256 : i32
    %6 = arith.subi %c256_i32, %5 : i32
    %7 = tpu.iota {dimensions = array<i32: 0>} : vector<8x128xi32>
    %c128_i32 = arith.constant 128 : i32
    %8 = vector.broadcast %c128_i32 : i32 to vector<8x128xi32>
    %9 = arith.muli %7, %8 : vector<8x128xi32>
    %10 = tpu.iota {dimensions = array<i32: 1>} : vector<8x128xi32>
    %11 = arith.addi %9, %10 : vector<8x128xi32>
    %cst = arith.constant 0.000000e+00 : f32
    %12 = vector.broadcast %cst : f32 to vector<8x128xf32>
    %cst_1 = arith.constant 9.99989986 : f32
    %c0_i32_2 = arith.constant 0 : i32
    %c8_i32 = arith.constant 8 : i32
    %13 = arith.muli %c0_i32_2, %c8_i32 : i32
    %14 = tpu.assume_multiple %13, 8 : i32
    %15 = arith.index_cast %14 : i32 to index
    %c0 = arith.constant 0 : index
    %16 = vector.load %arg2[%15, %c0] : memref<8x128xf32, #tpu.memory_space<vmem>>, vector<8x128xf32>
    %17 = arith.index_cast %14 : i32 to index
    %c0_3 = arith.constant 0 : index
    %18 = vector.load %arg3[%17, %c0_3] : memref<8x128xf32, #tpu.memory_space<vmem>>, vector<8x128xf32>
    %19 = math.absf %16 : vector<8x128xf32>
    %cst_4 = arith.constant 0.000000e+00 : f32
    %20 = vector.broadcast %cst_4 : f32 to vector<8x128xf32>
    %21 = arith.subf %20, %19 : vector<8x128xf32>
    %22 = math.exp %21 : vector<8x128xf32>
    %cst_5 = arith.constant 0.000000e+00 : f32
    %23 = vector.broadcast %cst_5 : f32 to vector<8x128xf32>
    %24 = arith.cmpf oge, %16, %23 : vector<8x128xf32>
    %cst_6 = arith.constant 1.000000e+00 : f32
    %25 = vector.broadcast %cst_6 : f32 to vector<8x128xf32>
    %26 = arith.select %24, %25, %22 : vector<8x128xi1>, vector<8x128xf32>
    %cst_7 = arith.constant 1.000000e+00 : f32
    %27 = vector.broadcast %cst_7 : f32 to vector<8x128xf32>
    %28 = arith.addf %27, %22 : vector<8x128xf32>
    %29 = arith.divf %26, %28 : vector<8x128xf32>
    %30 = arith.subf %29, %18 : vector<8x128xf32>
    %31 = math.absf %30 : vector<8x128xf32>
    %cst_8 = arith.constant 0.000000e+00 : f32
    %32 = vector.broadcast %cst_8 : f32 to vector<8x128xf32>
    %33 = arith.maximumf %16, %32 : vector<8x128xf32>
    %34 = arith.mulf %16, %18 : vector<8x128xf32>
    %35 = arith.subf %33, %34 : vector<8x128xf32>
    %36 = math.log1p %22 : vector<8x128xf32>
    %37 = arith.addf %35, %36 : vector<8x128xf32>
    %38 = vector.broadcast %cst_1 : f32 to vector<8x128xf32>
    %39 = arith.mulf %31, %38 : vector<8x128xf32>
    %40 = arith.fptosi %39 : vector<8x128xf32> to vector<8x128xi32>
    %c1024_i32_9 = arith.constant 1024 : i32
    %41 = arith.muli %c0_i32_2, %c1024_i32_9 : i32
    %42 = arith.subi %6, %41 : i32
    %43 = vector.broadcast %42 : i32 to vector<8x128xi32>
    %44 = arith.cmpi slt, %11, %43 : vector<8x128xi32>
    %c-1_i32 = arith.constant -1 : i32
    %45 = vector.broadcast %c-1_i32 : i32 to vector<8x128xi32>
    %46 = arith.select %44, %40, %45 : vector<8x128xi1>, vector<8x128xi32>
    %cst_10 = arith.constant 0.000000e+00 : f32
    %47 = vector.broadcast %cst_10 : f32 to vector<8x128xf32>
    %48 = arith.select %44, %37, %47 : vector<8x128xi1>, vector<8x128xf32>
    %c0_i32_11 = arith.constant 0 : i32
    %49 = vector.broadcast %c0_i32_11 : i32 to vector<8x128xi32>
    %50 = arith.cmpi eq, %46, %49 : vector<8x128xi32>
    %cst_12 = arith.constant 1.000000e+00 : f32
    %cst_13 = arith.constant 0.000000e+00 : f32
    %51 = vector.broadcast %cst_12 : f32 to vector<8x128xf32>
    %52 = vector.broadcast %cst_13 : f32 to vector<8x128xf32>
    %53 = arith.select %50, %51, %52 : vector<8x128xi1>, vector<8x128xf32>
    %54 = arith.addf %12, %53 : vector<8x128xf32>
    %cst_14 = arith.constant 0.000000e+00 : f32
    %55 = vector.broadcast %cst_14 : f32 to vector<8x128xf32>
    %56 = arith.select %50, %48, %55 : vector<8x128xi1>, vector<8x128xf32>
    %57 = arith.addf %12, %56 : vector<8x128xf32>
    %c1_i32_15 = arith.constant 1 : i32
    %58 = vector.broadcast %c1_i32_15 : i32 to vector<8x128xi32>
    %59 = arith.cmpi eq, %46, %58 : vector<8x128xi32>
    %cst_16 = arith.constant 1.000000e+00 : f32
    %cst_17 = arith.constant 0.000000e+00 : f32
    %60 = vector.broadcast %cst_16 : f32 to vector<8x128xf32>
    %61 = vector.broadcast %cst_17 : f32 to vector<8x128xf32>
    %62 = arith.select %59, %60, %61 : vector<8x128xi1>, vector<8x128xf32>
    %63 = arith.addf %12, %62 : vector<8x128xf32>
    %cst_18 = arith.constant 0.000000e+00 : f32
    %64 = vector.broadcast %cst_18 : f32 to vector<8x128xf32>
    %65 = arith.select %59, %48, %64 : vector<8x128xi1>, vector<8x128xf32>
    %66 = arith.addf %12, %65 : vector<8x128xf32>
    %c2_i32 = arith.constant 2 : i32
    %67 = vector.broadcast %c2_i32 : i32 to vector<8x128xi32>
    %68 = arith.cmpi eq, %46, %67 : vector<8x128xi32>
    %cst_19 = arith.constant 1.000000e+00 : f32
    %cst_20 = arith.constant 0.000000e+00 : f32
    %69 = vector.broadcast %cst_19 : f32 to vector<8x128xf32>
    %70 = vector.broadcast %cst_20 : f32 to vector<8x128xf32>
    %71 = arith.select %68, %69, %70 : vector<8x128xi1>, vector<8x128xf32>
    %72 = arith.addf %12, %71 : vector<8x128xf32>
    %cst_21 = arith.constant 0.000000e+00 : f32
    %73 = vector.broadcast %cst_21 : f32 to vector<8x128xf32>
    %74 = arith.select %68, %48, %73 : vector<8x128xi1>, vector<8x128xf32>
    %75 = arith.addf %12, %74 : vector<8x128xf32>
    %c3_i32 = arith.constant 3 : i32
    %76 = vector.broadcast %c3_i32 : i32 to vector<8x128xi32>
    %77 = arith.cmpi eq, %46, %76 : vector<8x128xi32>
    %cst_22 = arith.constant 1.000000e+00 : f32
    %cst_23 = arith.constant 0.000000e+00 : f32
    %78 = vector.broadcast %cst_22 : f32 to vector<8x128xf32>
    %79 = vector.broadcast %cst_23 : f32 to vector<8x128xf32>
    %80 = arith.select %77, %78, %79 : vector<8x128xi1>, vector<8x128xf32>
    %81 = arith.addf %12, %80 : vector<8x128xf32>
    %cst_24 = arith.constant 0.000000e+00 : f32
    %82 = vector.broadcast %cst_24 : f32 to vector<8x128xf32>
    %83 = arith.select %77, %48, %82 : vector<8x128xi1>, vector<8x128xf32>
    %84 = arith.addf %12, %83 : vector<8x128xf32>
    %c4_i32 = arith.constant 4 : i32
    %85 = vector.broadcast %c4_i32 : i32 to vector<8x128xi32>
    %86 = arith.cmpi eq, %46, %85 : vector<8x128xi32>
    %cst_25 = arith.constant 1.000000e+00 : f32
    %cst_26 = arith.constant 0.000000e+00 : f32
    %87 = vector.broadcast %cst_25 : f32 to vector<8x128xf32>
    %88 = vector.broadcast %cst_26 : f32 to vector<8x128xf32>
    %89 = arith.select %86, %87, %88 : vector<8x128xi1>, vector<8x128xf32>
    %90 = arith.addf %12, %89 : vector<8x128xf32>
    %cst_27 = arith.constant 0.000000e+00 : f32
    %91 = vector.broadcast %cst_27 : f32 to vector<8x128xf32>
    %92 = arith.select %86, %48, %91 : vector<8x128xi1>, vector<8x128xf32>
    %93 = arith.addf %12, %92 : vector<8x128xf32>
    %c5_i32 = arith.constant 5 : i32
    %94 = vector.broadcast %c5_i32 : i32 to vector<8x128xi32>
    %95 = arith.cmpi eq, %46, %94 : vector<8x128xi32>
    %cst_28 = arith.constant 1.000000e+00 : f32
    %cst_29 = arith.constant 0.000000e+00 : f32
    %96 = vector.broadcast %cst_28 : f32 to vector<8x128xf32>
    %97 = vector.broadcast %cst_29 : f32 to vector<8x128xf32>
    %98 = arith.select %95, %96, %97 : vector<8x128xi1>, vector<8x128xf32>
    %99 = arith.addf %12, %98 : vector<8x128xf32>
    %cst_30 = arith.constant 0.000000e+00 : f32
    %100 = vector.broadcast %cst_30 : f32 to vector<8x128xf32>
    %101 = arith.select %95, %48, %100 : vector<8x128xi1>, vector<8x128xf32>
    %102 = arith.addf %12, %101 : vector<8x128xf32>
    %c6_i32 = arith.constant 6 : i32
    %103 = vector.broadcast %c6_i32 : i32 to vector<8x128xi32>
    %104 = arith.cmpi eq, %46, %103 : vector<8x128xi32>
    %cst_31 = arith.constant 1.000000e+00 : f32
    %cst_32 = arith.constant 0.000000e+00 : f32
    %105 = vector.broadcast %cst_31 : f32 to vector<8x128xf32>
    %106 = vector.broadcast %cst_32 : f32 to vector<8x128xf32>
    %107 = arith.select %104, %105, %106 : vector<8x128xi1>, vector<8x128xf32>
    %108 = arith.addf %12, %107 : vector<8x128xf32>
    %cst_33 = arith.constant 0.000000e+00 : f32
    %109 = vector.broadcast %cst_33 : f32 to vector<8x128xf32>
    %110 = arith.select %104, %48, %109 : vector<8x128xi1>, vector<8x128xf32>
    %111 = arith.addf %12, %110 : vector<8x128xf32>
    %c7_i32 = arith.constant 7 : i32
    %112 = vector.broadcast %c7_i32 : i32 to vector<8x128xi32>
    %113 = arith.cmpi eq, %46, %112 : vector<8x128xi32>
    %cst_34 = arith.constant 1.000000e+00 : f32
    %cst_35 = arith.constant 0.000000e+00 : f32
    %114 = vector.broadcast %cst_34 : f32 to vector<8x128xf32>
    %115 = vector.broadcast %cst_35 : f32 to vector<8x128xf32>
    %116 = arith.select %113, %114, %115 : vector<8x128xi1>, vector<8x128xf32>
    %117 = arith.addf %12, %116 : vector<8x128xf32>
    %cst_36 = arith.constant 0.000000e+00 : f32
    %118 = vector.broadcast %cst_36 : f32 to vector<8x128xf32>
    %119 = arith.select %113, %48, %118 : vector<8x128xi1>, vector<8x128xf32>
    %120 = arith.addf %12, %119 : vector<8x128xf32>
    %c8_i32_37 = arith.constant 8 : i32
    %121 = vector.broadcast %c8_i32_37 : i32 to vector<8x128xi32>
    %122 = arith.cmpi eq, %46, %121 : vector<8x128xi32>
    %cst_38 = arith.constant 1.000000e+00 : f32
    %cst_39 = arith.constant 0.000000e+00 : f32
    %123 = vector.broadcast %cst_38 : f32 to vector<8x128xf32>
    %124 = vector.broadcast %cst_39 : f32 to vector<8x128xf32>
    %125 = arith.select %122, %123, %124 : vector<8x128xi1>, vector<8x128xf32>
    %126 = arith.addf %12, %125 : vector<8x128xf32>
    %cst_40 = arith.constant 0.000000e+00 : f32
    %127 = vector.broadcast %cst_40 : f32 to vector<8x128xf32>
    %128 = arith.select %122, %48, %127 : vector<8x128xi1>, vector<8x128xf32>
    %129 = arith.addf %12, %128 : vector<8x128xf32>
    %c9_i32 = arith.constant 9 : i32
    %130 = vector.broadcast %c9_i32 : i32 to vector<8x128xi32>
    %131 = arith.cmpi eq, %46, %130 : vector<8x128xi32>
    %cst_41 = arith.constant 1.000000e+00 : f32
    %cst_42 = arith.constant 0.000000e+00 : f32
    %132 = vector.broadcast %cst_41 : f32 to vector<8x128xf32>
    %133 = vector.broadcast %cst_42 : f32 to vector<8x128xf32>
    %134 = arith.select %131, %132, %133 : vector<8x128xi1>, vector<8x128xf32>
    %135 = arith.addf %12, %134 : vector<8x128xf32>
    %cst_43 = arith.constant 0.000000e+00 : f32
    %136 = vector.broadcast %cst_43 : f32 to vector<8x128xf32>
    %137 = arith.select %131, %48, %136 : vector<8x128xi1>, vector<8x128xf32>
    %138 = arith.addf %12, %137 : vector<8x128xf32>
    %c1_i32_44 = arith.constant 1 : i32
    %c0_45 = arith.constant 0 : index
    %c0_46 = arith.constant 0 : index
    %c0_47 = arith.constant 0 : index
    %c0_48 = arith.constant 0 : index
    %139 = vector.load %arg4[%c0_45, %c0_46, %c0_47, %c0_48] : memref<1x10x8x128xf32, #tpu.memory_space<vmem>>, vector<1x1x8x128xf32>
    %140 = vector.shape_cast %139 : vector<1x1x8x128xf32> to vector<8x128xf32>
    %141 = arith.addf %140, %54 : vector<8x128xf32>
    %c0_49 = arith.constant 0 : index
    %c0_50 = arith.constant 0 : index
    %c0_51 = arith.constant 0 : index
    %c0_52 = arith.constant 0 : index
    %142 = vector.load %arg4[%c0_49, %c0_50, %c0_51, %c0_52] : memref<1x10x8x128xf32, #tpu.memory_space<vmem>>, vector<1x1x8x128xf32>
    %143 = vector.shape_cast %142 : vector<1x1x8x128xf32> to vector<8x128xf32>
    %144 = vector.shape_cast %141 : vector<8x128xf32> to vector<1x1x8x128xf32>
    tpu.vector_store %arg4[%c0_49, %c0_50, %c0_51, %c0_52], %144 {strides = array<i32>} : memref<1x10x8x128xf32, #tpu.memory_space<vmem>>, vector<1x1x8x128xf32>,
    %c0_53 = arith.constant 0 : index
    %c0_54 = arith.constant 0 : index
    %c0_55 = arith.constant 0 : index
    %c0_56 = arith.constant 0 : index
    %145 = vector.load %arg5[%c0_53, %c0_54, %c0_55, %c0_56] : memref<1x10x8x128xf32, #tpu.memory_space<vmem>>, vector<1x1x8x128xf32>
    %146 = vector.shape_cast %145 : vector<1x1x8x128xf32> to vector<8x128xf32>
    %147 = arith.addf %146, %57 : vector<8x128xf32>
    %c0_57 = arith.constant 0 : index
    %c0_58 = arith.constant 0 : index
    %c0_59 = arith.constant 0 : index
    %c0_60 = arith.constant 0 : index
    %148 = vector.load %arg5[%c0_57, %c0_58, %c0_59, %c0_60] : memref<1x10x8x128xf32, #tpu.memory_space<vmem>>, vector<1x1x8x128xf32>
    %149 = vector.shape_cast %148 : vector<1x1x8x128xf32> to vector<8x128xf32>
    %150 = vector.shape_cast %147 : vector<8x128xf32> to vector<1x1x8x128xf32>
    tpu.vector_store %arg5[%c0_57, %c0_58, %c0_59, %c0_60], %150 {strides = array<i32>} : memref<1x10x8x128xf32, #tpu.memory_space<vmem>>, vector<1x1x8x128xf32>,
    %c0_61 = arith.constant 0 : index
    %c1 = arith.constant 1 : index
    %c0_62 = arith.constant 0 : index
    %c0_63 = arith.constant 0 : index
    %151 = vector.load %arg4[%c0_61, %c1, %c0_62, %c0_63] : memref<1x10x8x128xf32, #tpu.memory_space<vmem>>, vector<1x1x8x128xf32>
    %152 = vector.shape_cast %151 : vector<1x1x8x128xf32> to vector<8x128xf32>
    %153 = arith.addf %152, %63 : vector<8x128xf32>
    %c0_64 = arith.constant 0 : index
    %c1_65 = arith.constant 1 : index
    %c0_66 = arith.constant 0 : index
    %c0_67 = arith.constant 0 : index
    %154 = vector.load %arg4[%c0_64, %c1_65, %c0_66, %c0_67] : memref<1x10x8x128xf32, #tpu.memory_space<vmem>>, vector<1x1x8x128xf32>
    %155 = vector.shape_cast %154 : vector<1x1x8x128xf32> to vector<8x128xf32>
    %156 = vector.shape_cast %153 : vector<8x128xf32> to vector<1x1x8x128xf32>
    tpu.vector_store %arg4[%c0_64, %c1_65, %c0_66, %c0_67], %156 {strides = array<i32>} : memref<1x10x8x128xf32, #tpu.memory_space<vmem>>, vector<1x1x8x128xf32>,
    %c0_68 = arith.constant 0 : index
    %c1_69 = arith.constant 1 : index
    %c0_70 = arith.constant 0 : index
    %c0_71 = arith.constant 0 : index
    %157 = vector.load %arg5[%c0_68, %c1_69, %c0_70, %c0_71] : memref<1x10x8x128xf32, #tpu.memory_space<vmem>>, vector<1x1x8x128xf32>
    %158 = vector.shape_cast %157 : vector<1x1x8x128xf32> to vector<8x128xf32>
    %159 = arith.addf %158, %66 : vector<8x128xf32>
    %c0_72 = arith.constant 0 : index
    %c1_73 = arith.constant 1 : index
    %c0_74 = arith.constant 0 : index
    %c0_75 = arith.constant 0 : index
    %160 = vector.load %arg5[%c0_72, %c1_73, %c0_74, %c0_75] : memref<1x10x8x128xf32, #tpu.memory_space<vmem>>, vector<1x1x8x128xf32>
    %161 = vector.shape_cast %160 : vector<1x1x8x128xf32> to vector<8x128xf32>
    %162 = vector.shape_cast %159 : vector<8x128xf32> to vector<1x1x8x128xf32>
    tpu.vector_store %arg5[%c0_72, %c1_73, %c0_74, %c0_75], %162 {strides = array<i32>} : memref<1x10x8x128xf32, #tpu.memory_space<vmem>>, vector<1x1x8x128xf32>,
    %c0_76 = arith.constant 0 : index
    %c2 = arith.constant 2 : index
    %c0_77 = arith.constant 0 : index
    %c0_78 = arith.constant 0 : index
    %163 = vector.load %arg4[%c0_76, %c2, %c0_77, %c0_78] : memref<1x10x8x128xf32, #tpu.memory_space<vmem>>, vector<1x1x8x128xf32>
    %164 = vector.shape_cast %163 : vector<1x1x8x128xf32> to vector<8x128xf32>
    %165 = arith.addf %164, %72 : vector<8x128xf32>
    %c0_79 = arith.constant 0 : index
    %c2_80 = arith.constant 2 : index
    %c0_81 = arith.constant 0 : index
    %c0_82 = arith.constant 0 : index
    %166 = vector.load %arg4[%c0_79, %c2_80, %c0_81, %c0_82] : memref<1x10x8x128xf32, #tpu.memory_space<vmem>>, vector<1x1x8x128xf32>
    %167 = vector.shape_cast %166 : vector<1x1x8x128xf32> to vector<8x128xf32>
    %168 = vector.shape_cast %165 : vector<8x128xf32> to vector<1x1x8x128xf32>
    tpu.vector_store %arg4[%c0_79, %c2_80, %c0_81, %c0_82], %168 {strides = array<i32>} : memref<1x10x8x128xf32, #tpu.memory_space<vmem>>, vector<1x1x8x128xf32>,
    %c0_83 = arith.constant 0 : index
    %c2_84 = arith.constant 2 : index
    %c0_85 = arith.constant 0 : index
    %c0_86 = arith.constant 0 : index
    %169 = vector.load %arg5[%c0_83, %c2_84, %c0_85, %c0_86] : memref<1x10x8x128xf32, #tpu.memory_space<vmem>>, vector<1x1x8x128xf32>
    %170 = vector.shape_cast %169 : vector<1x1x8x128xf32> to vector<8x128xf32>
    %171 = arith.addf %170, %75 : vector<8x128xf32>
    %c0_87 = arith.constant 0 : index
    %c2_88 = arith.constant 2 : index
    %c0_89 = arith.constant 0 : index
    %c0_90 = arith.constant 0 : index
    %172 = vector.load %arg5[%c0_87, %c2_88, %c0_89, %c0_90] : memref<1x10x8x128xf32, #tpu.memory_space<vmem>>, vector<1x1x8x128xf32>
    %173 = vector.shape_cast %172 : vector<1x1x8x128xf32> to vector<8x128xf32>
    %174 = vector.shape_cast %171 : vector<8x128xf32> to vector<1x1x8x128xf32>
    tpu.vector_store %arg5[%c0_87, %c2_88, %c0_89, %c0_90], %174 {strides = array<i32>} : memref<1x10x8x128xf32, #tpu.memory_space<vmem>>, vector<1x1x8x128xf32>,
    %c0_91 = arith.constant 0 : index
    %c3 = arith.constant 3 : index
    %c0_92 = arith.constant 0 : index
    %c0_93 = arith.constant 0 : index
    %175 = vector.load %arg4[%c0_91, %c3, %c0_92, %c0_93] : memref<1x10x8x128xf32, #tpu.memory_space<vmem>>, vector<1x1x8x128xf32>
    %176 = vector.shape_cast %175 : vector<1x1x8x128xf32> to vector<8x128xf32>
    %177 = arith.addf %176, %81 : vector<8x128xf32>
    %c0_94 = arith.constant 0 : index
    %c3_95 = arith.constant 3 : index
    %c0_96 = arith.constant 0 : index
    %c0_97 = arith.constant 0 : index
    %178 = vector.load %arg4[%c0_94, %c3_95, %c0_96, %c0_97] : memref<1x10x8x128xf32, #tpu.memory_space<vmem>>, vector<1x1x8x128xf32>
    %179 = vector.shape_cast %178 : vector<1x1x8x128xf32> to vector<8x128xf32>
    %180 = vector.shape_cast %177 : vector<8x128xf32> to vector<1x1x8x128xf32>
    tpu.vector_store %arg4[%c0_94, %c3_95, %c0_96, %c0_97], %180 {strides = array<i32>} : memref<1x10x8x128xf32, #tpu.memory_space<vmem>>, vector<1x1x8x128xf32>,
    %c0_98 = arith.constant 0 : index
    %c3_99 = arith.constant 3 : index
    %c0_100 = arith.constant 0 : index
    %c0_101 = arith.constant 0 : index
    %181 = vector.load %arg5[%c0_98, %c3_99, %c0_100, %c0_101] : memref<1x10x8x128xf32, #tpu.memory_space<vmem>>, vector<1x1x8x128xf32>
    %182 = vector.shape_cast %181 : vector<1x1x8x128xf32> to vector<8x128xf32>
    %183 = arith.addf %182, %84 : vector<8x128xf32>
    %c0_102 = arith.constant 0 : index
    %c3_103 = arith.constant 3 : index
    %c0_104 = arith.constant 0 : index
    %c0_105 = arith.constant 0 : index
    %184 = vector.load %arg5[%c0_102, %c3_103, %c0_104, %c0_105] : memref<1x10x8x128xf32, #tpu.memory_space<vmem>>, vector<1x1x8x128xf32>
    %185 = vector.shape_cast %184 : vector<1x1x8x128xf32> to vector<8x128xf32>
    %186 = vector.shape_cast %183 : vector<8x128xf32> to vector<1x1x8x128xf32>
    tpu.vector_store %arg5[%c0_102, %c3_103, %c0_104, %c0_105], %186 {strides = array<i32>} : memref<1x10x8x128xf32, #tpu.memory_space<vmem>>, vector<1x1x8x128xf32>,
    %c0_106 = arith.constant 0 : index
    %c4 = arith.constant 4 : index
    %c0_107 = arith.constant 0 : index
    %c0_108 = arith.constant 0 : index
    %187 = vector.load %arg4[%c0_106, %c4, %c0_107, %c0_108] : memref<1x10x8x128xf32, #tpu.memory_space<vmem>>, vector<1x1x8x128xf32>
    %188 = vector.shape_cast %187 : vector<1x1x8x128xf32> to vector<8x128xf32>
    %189 = arith.addf %188, %90 : vector<8x128xf32>
    %c0_109 = arith.constant 0 : index
    %c4_110 = arith.constant 4 : index
    %c0_111 = arith.constant 0 : index
    %c0_112 = arith.constant 0 : index
    %190 = vector.load %arg4[%c0_109, %c4_110, %c0_111, %c0_112] : memref<1x10x8x128xf32, #tpu.memory_space<vmem>>, vector<1x1x8x128xf32>
    %191 = vector.shape_cast %190 : vector<1x1x8x128xf32> to vector<8x128xf32>
    %192 = vector.shape_cast %189 : vector<8x128xf32> to vector<1x1x8x128xf32>
    tpu.vector_store %arg4[%c0_109, %c4_110, %c0_111, %c0_112], %192 {strides = array<i32>} : memref<1x10x8x128xf32, #tpu.memory_space<vmem>>, vector<1x1x8x128xf32>,
    %c0_113 = arith.constant 0 : index
    %c4_114 = arith.constant 4 : index
    %c0_115 = arith.constant 0 : index
    %c0_116 = arith.constant 0 : index
    %193 = vector.load %arg5[%c0_113, %c4_114, %c0_115, %c0_116] : memref<1x10x8x128xf32, #tpu.memory_space<vmem>>, vector<1x1x8x128xf32>
    %194 = vector.shape_cast %193 : vector<1x1x8x128xf32> to vector<8x128xf32>
    %195 = arith.addf %194, %93 : vector<8x128xf32>
    %c0_117 = arith.constant 0 : index
    %c4_118 = arith.constant 4 : index
    %c0_119 = arith.constant 0 : index
    %c0_120 = arith.constant 0 : index
    %196 = vector.load %arg5[%c0_117, %c4_118, %c0_119, %c0_120] : memref<1x10x8x128xf32, #tpu.memory_space<vmem>>, vector<1x1x8x128xf32>
    %197 = vector.shape_cast %196 : vector<1x1x8x128xf32> to vector<8x128xf32>
    %198 = vector.shape_cast %195 : vector<8x128xf32> to vector<1x1x8x128xf32>
    tpu.vector_store %arg5[%c0_117, %c4_118, %c0_119, %c0_120], %198 {strides = array<i32>} : memref<1x10x8x128xf32, #tpu.memory_space<vmem>>, vector<1x1x8x128xf32>,
    %c0_121 = arith.constant 0 : index
    %c5 = arith.constant 5 : index
    %c0_122 = arith.constant 0 : index
    %c0_123 = arith.constant 0 : index
    %199 = vector.load %arg4[%c0_121, %c5, %c0_122, %c0_123] : memref<1x10x8x128xf32, #tpu.memory_space<vmem>>, vector<1x1x8x128xf32>
    %200 = vector.shape_cast %199 : vector<1x1x8x128xf32> to vector<8x128xf32>
    %201 = arith.addf %200, %99 : vector<8x128xf32>
    %c0_124 = arith.constant 0 : index
    %c5_125 = arith.constant 5 : index
    %c0_126 = arith.constant 0 : index
    %c0_127 = arith.constant 0 : index
    %202 = vector.load %arg4[%c0_124, %c5_125, %c0_126, %c0_127] : memref<1x10x8x128xf32, #tpu.memory_space<vmem>>, vector<1x1x8x128xf32>
    %203 = vector.shape_cast %202 : vector<1x1x8x128xf32> to vector<8x128xf32>
    %204 = vector.shape_cast %201 : vector<8x128xf32> to vector<1x1x8x128xf32>
    tpu.vector_store %arg4[%c0_124, %c5_125, %c0_126, %c0_127], %204 {strides = array<i32>} : memref<1x10x8x128xf32, #tpu.memory_space<vmem>>, vector<1x1x8x128xf32>,
    %c0_128 = arith.constant 0 : index
    %c5_129 = arith.constant 5 : index
    %c0_130 = arith.constant 0 : index
    %c0_131 = arith.constant 0 : index
    %205 = vector.load %arg5[%c0_128, %c5_129, %c0_130, %c0_131] : memref<1x10x8x128xf32, #tpu.memory_space<vmem>>, vector<1x1x8x128xf32>
    %206 = vector.shape_cast %205 : vector<1x1x8x128xf32> to vector<8x128xf32>
    %207 = arith.addf %206, %102 : vector<8x128xf32>
    %c0_132 = arith.constant 0 : index
    %c5_133 = arith.constant 5 : index
    %c0_134 = arith.constant 0 : index
    %c0_135 = arith.constant 0 : index
    %208 = vector.load %arg5[%c0_132, %c5_133, %c0_134, %c0_135] : memref<1x10x8x128xf32, #tpu.memory_space<vmem>>, vector<1x1x8x128xf32>
    %209 = vector.shape_cast %208 : vector<1x1x8x128xf32> to vector<8x128xf32>
    %210 = vector.shape_cast %207 : vector<8x128xf32> to vector<1x1x8x128xf32>
    tpu.vector_store %arg5[%c0_132, %c5_133, %c0_134, %c0_135], %210 {strides = array<i32>} : memref<1x10x8x128xf32, #tpu.memory_space<vmem>>, vector<1x1x8x128xf32>,
    %c0_136 = arith.constant 0 : index
    %c6 = arith.constant 6 : index
    %c0_137 = arith.constant 0 : index
    %c0_138 = arith.constant 0 : index
    %211 = vector.load %arg4[%c0_136, %c6, %c0_137, %c0_138] : memref<1x10x8x128xf32, #tpu.memory_space<vmem>>, vector<1x1x8x128xf32>
    %212 = vector.shape_cast %211 : vector<1x1x8x128xf32> to vector<8x128xf32>
    %213 = arith.addf %212, %108 : vector<8x128xf32>
    %c0_139 = arith.constant 0 : index
    %c6_140 = arith.constant 6 : index
    %c0_141 = arith.constant 0 : index
    %c0_142 = arith.constant 0 : index
    %214 = vector.load %arg4[%c0_139, %c6_140, %c0_141, %c0_142] : memref<1x10x8x128xf32, #tpu.memory_space<vmem>>, vector<1x1x8x128xf32>
    %215 = vector.shape_cast %214 : vector<1x1x8x128xf32> to vector<8x128xf32>
    %216 = vector.shape_cast %213 : vector<8x128xf32> to vector<1x1x8x128xf32>
    tpu.vector_store %arg4[%c0_139, %c6_140, %c0_141, %c0_142], %216 {strides = array<i32>} : memref<1x10x8x128xf32, #tpu.memory_space<vmem>>, vector<1x1x8x128xf32>,
    %c0_143 = arith.constant 0 : index
    %c6_144 = arith.constant 6 : index
    %c0_145 = arith.constant 0 : index
    %c0_146 = arith.constant 0 : index
    %217 = vector.load %arg5[%c0_143, %c6_144, %c0_145, %c0_146] : memref<1x10x8x128xf32, #tpu.memory_space<vmem>>, vector<1x1x8x128xf32>
    %218 = vector.shape_cast %217 : vector<1x1x8x128xf32> to vector<8x128xf32>
    %219 = arith.addf %218, %111 : vector<8x128xf32>
    %c0_147 = arith.constant 0 : index
    %c6_148 = arith.constant 6 : index
    %c0_149 = arith.constant 0 : index
    %c0_150 = arith.constant 0 : index
    %220 = vector.load %arg5[%c0_147, %c6_148, %c0_149, %c0_150] : memref<1x10x8x128xf32, #tpu.memory_space<vmem>>, vector<1x1x8x128xf32>
    %221 = vector.shape_cast %220 : vector<1x1x8x128xf32> to vector<8x128xf32>
    %222 = vector.shape_cast %219 : vector<8x128xf32> to vector<1x1x8x128xf32>
    tpu.vector_store %arg5[%c0_147, %c6_148, %c0_149, %c0_150], %222 {strides = array<i32>} : memref<1x10x8x128xf32, #tpu.memory_space<vmem>>, vector<1x1x8x128xf32>,
    %c0_151 = arith.constant 0 : index
    %c7 = arith.constant 7 : index
    %c0_152 = arith.constant 0 : index
    %c0_153 = arith.constant 0 : index
    %223 = vector.load %arg4[%c0_151, %c7, %c0_152, %c0_153] : memref<1x10x8x128xf32, #tpu.memory_space<vmem>>, vector<1x1x8x128xf32>
    %224 = vector.shape_cast %223 : vector<1x1x8x128xf32> to vector<8x128xf32>
    %225 = arith.addf %224, %117 : vector<8x128xf32>
    %c0_154 = arith.constant 0 : index
    %c7_155 = arith.constant 7 : index
    %c0_156 = arith.constant 0 : index
    %c0_157 = arith.constant 0 : index
    %226 = vector.load %arg4[%c0_154, %c7_155, %c0_156, %c0_157] : memref<1x10x8x128xf32, #tpu.memory_space<vmem>>, vector<1x1x8x128xf32>
    %227 = vector.shape_cast %226 : vector<1x1x8x128xf32> to vector<8x128xf32>
    %228 = vector.shape_cast %225 : vector<8x128xf32> to vector<1x1x8x128xf32>
    tpu.vector_store %arg4[%c0_154, %c7_155, %c0_156, %c0_157], %228 {strides = array<i32>} : memref<1x10x8x128xf32, #tpu.memory_space<vmem>>, vector<1x1x8x128xf32>,
    %c0_158 = arith.constant 0 : index
    %c7_159 = arith.constant 7 : index
    %c0_160 = arith.constant 0 : index
    %c0_161 = arith.constant 0 : index
    %229 = vector.load %arg5[%c0_158, %c7_159, %c0_160, %c0_161] : memref<1x10x8x128xf32, #tpu.memory_space<vmem>>, vector<1x1x8x128xf32>
    %230 = vector.shape_cast %229 : vector<1x1x8x128xf32> to vector<8x128xf32>
    %231 = arith.addf %230, %120 : vector<8x128xf32>
    %c0_162 = arith.constant 0 : index
    %c7_163 = arith.constant 7 : index
    %c0_164 = arith.constant 0 : index
    %c0_165 = arith.constant 0 : index
    %232 = vector.load %arg5[%c0_162, %c7_163, %c0_164, %c0_165] : memref<1x10x8x128xf32, #tpu.memory_space<vmem>>, vector<1x1x8x128xf32>
    %233 = vector.shape_cast %232 : vector<1x1x8x128xf32> to vector<8x128xf32>
    %234 = vector.shape_cast %231 : vector<8x128xf32> to vector<1x1x8x128xf32>
    tpu.vector_store %arg5[%c0_162, %c7_163, %c0_164, %c0_165], %234 {strides = array<i32>} : memref<1x10x8x128xf32, #tpu.memory_space<vmem>>, vector<1x1x8x128xf32>,
    %c0_166 = arith.constant 0 : index
    %c8 = arith.constant 8 : index
    %c0_167 = arith.constant 0 : index
    %c0_168 = arith.constant 0 : index
    %235 = vector.load %arg4[%c0_166, %c8, %c0_167, %c0_168] : memref<1x10x8x128xf32, #tpu.memory_space<vmem>>, vector<1x1x8x128xf32>
    %236 = vector.shape_cast %235 : vector<1x1x8x128xf32> to vector<8x128xf32>
    %237 = arith.addf %236, %126 : vector<8x128xf32>
    %c0_169 = arith.constant 0 : index
    %c8_170 = arith.constant 8 : index
    %c0_171 = arith.constant 0 : index
    %c0_172 = arith.constant 0 : index
    %238 = vector.load %arg4[%c0_169, %c8_170, %c0_171, %c0_172] : memref<1x10x8x128xf32, #tpu.memory_space<vmem>>, vector<1x1x8x128xf32>
    %239 = vector.shape_cast %238 : vector<1x1x8x128xf32> to vector<8x128xf32>
    %240 = vector.shape_cast %237 : vector<8x128xf32> to vector<1x1x8x128xf32>
    tpu.vector_store %arg4[%c0_169, %c8_170, %c0_171, %c0_172], %240 {strides = array<i32>} : memref<1x10x8x128xf32, #tpu.memory_space<vmem>>, vector<1x1x8x128xf32>,
    %c0_173 = arith.constant 0 : index
    %c8_174 = arith.constant 8 : index
    %c0_175 = arith.constant 0 : index
    %c0_176 = arith.constant 0 : index
    %241 = vector.load %arg5[%c0_173, %c8_174, %c0_175, %c0_176] : memref<1x10x8x128xf32, #tpu.memory_space<vmem>>, vector<1x1x8x128xf32>
    %242 = vector.shape_cast %241 : vector<1x1x8x128xf32> to vector<8x128xf32>
    %243 = arith.addf %242, %129 : vector<8x128xf32>
    %c0_177 = arith.constant 0 : index
    %c8_178 = arith.constant 8 : index
    %c0_179 = arith.constant 0 : index
    %c0_180 = arith.constant 0 : index
    %244 = vector.load %arg5[%c0_177, %c8_178, %c0_179, %c0_180] : memref<1x10x8x128xf32, #tpu.memory_space<vmem>>, vector<1x1x8x128xf32>
    %245 = vector.shape_cast %244 : vector<1x1x8x128xf32> to vector<8x128xf32>
    %246 = vector.shape_cast %243 : vector<8x128xf32> to vector<1x1x8x128xf32>
    tpu.vector_store %arg5[%c0_177, %c8_178, %c0_179, %c0_180], %246 {strides = array<i32>} : memref<1x10x8x128xf32, #tpu.memory_space<vmem>>, vector<1x1x8x128xf32>,
    %c0_181 = arith.constant 0 : index
    %c9 = arith.constant 9 : index
    %c0_182 = arith.constant 0 : index
    %c0_183 = arith.constant 0 : index
    %247 = vector.load %arg4[%c0_181, %c9, %c0_182, %c0_183] : memref<1x10x8x128xf32, #tpu.memory_space<vmem>>, vector<1x1x8x128xf32>
    %248 = vector.shape_cast %247 : vector<1x1x8x128xf32> to vector<8x128xf32>
    %249 = arith.addf %248, %135 : vector<8x128xf32>
    %c0_184 = arith.constant 0 : index
    %c9_185 = arith.constant 9 : index
    %c0_186 = arith.constant 0 : index
    %c0_187 = arith.constant 0 : index
    %250 = vector.load %arg4[%c0_184, %c9_185, %c0_186, %c0_187] : memref<1x10x8x128xf32, #tpu.memory_space<vmem>>, vector<1x1x8x128xf32>
    %251 = vector.shape_cast %250 : vector<1x1x8x128xf32> to vector<8x128xf32>
    %252 = vector.shape_cast %249 : vector<8x128xf32> to vector<1x1x8x128xf32>
    tpu.vector_store %arg4[%c0_184, %c9_185, %c0_186, %c0_187], %252 {strides = array<i32>} : memref<1x10x8x128xf32, #tpu.memory_space<vmem>>, vector<1x1x8x128xf32>,
    %c0_188 = arith.constant 0 : index
    %c9_189 = arith.constant 9 : index
    %c0_190 = arith.constant 0 : index
    %c0_191 = arith.constant 0 : index
    %253 = vector.load %arg5[%c0_188, %c9_189, %c0_190, %c0_191] : memref<1x10x8x128xf32, #tpu.memory_space<vmem>>, vector<1x1x8x128xf32>
    %254 = vector.shape_cast %253 : vector<1x1x8x128xf32> to vector<8x128xf32>
    %255 = arith.addf %254, %138 : vector<8x128xf32>
    %c0_192 = arith.constant 0 : index
    %c9_193 = arith.constant 9 : index
    %c0_194 = arith.constant 0 : index
    %c0_195 = arith.constant 0 : index
    %256 = vector.load %arg5[%c0_192, %c9_193, %c0_194, %c0_195] : memref<1x10x8x128xf32, #tpu.memory_space<vmem>>, vector<1x1x8x128xf32>
    %257 = vector.shape_cast %256 : vector<1x1x8x128xf32> to vector<8x128xf32>
    %258 = vector.shape_cast %255 : vector<8x128xf32> to vector<1x1x8x128xf32>
    tpu.vector_store %arg5[%c0_192, %c9_193, %c0_194, %c0_195], %258 {strides = array<i32>} : memref<1x10x8x128xf32, #tpu.memory_space<vmem>>, vector<1x1x8x128xf32>,
    return
  }
  func.func @transform_0(%arg0: i32, %arg1: i32) -> (i32, i32) {
    %c1_i32 = arith.constant 1 : i32
    %0 = arith.muli %arg0, %c1_i32 : i32
    %1 = arith.addi %0, %arg1 : i32
    %c0_i32 = arith.constant 0 : i32
    %2 = arith.minsi %1, %c0_i32 : i32
    %c0_i32_0 = arith.constant 0 : i32
    %c0_i32_1 = arith.constant 0 : i32
    return %2, %c0_i32_0 : i32, i32
  }
  func.func @transform_1(%arg0: i32, %arg1: i32) -> (i32, i32) {
    %c1_i32 = arith.constant 1 : i32
    %0 = arith.muli %arg0, %c1_i32 : i32
    %1 = arith.addi %0, %arg1 : i32
    %c0_i32 = arith.constant 0 : i32
    %2 = arith.minsi %1, %c0_i32 : i32
    %c0_i32_0 = arith.constant 0 : i32
    %c0_i32_1 = arith.constant 0 : i32
    return %2, %c0_i32_0 : i32, i32
  }
  func.func @transform_2(%arg0: i32, %arg1: i32) -> (i32, i32, i32, i32) {
    %c0_i32 = arith.constant 0 : i32
    %c0_i32_0 = arith.constant 0 : i32
    %c0_i32_1 = arith.constant 0 : i32
    %c0_i32_2 = arith.constant 0 : i32
    return %arg0, %c0_i32, %c0_i32_0, %c0_i32_1 : i32, i32, i32, i32
  }
  func.func @transform_3(%arg0: i32, %arg1: i32) -> (i32, i32, i32, i32) {
    %c0_i32 = arith.constant 0 : i32
    %c0_i32_0 = arith.constant 0 : i32
    %c0_i32_1 = arith.constant 0 : i32
    %c0_i32_2 = arith.constant 0 : i32
    return %arg0, %c0_i32, %c0_i32_0, %c0_i32_1 : i32, i32, i32, i32
  }
}

</mosaic_0001>

<bundles_post_ra>
// kernel: tpu_custom_call.1
= control target key start
LH: loop header
LB: loop body
LE: loop exit
PB: predicated region body
PF: predicated region fallthrough
CT: control target
= control target key end

     0   :  { %9 = vsyncpa [#allocation3], 0  ;;  %s1295_s0 = inlined_call_operand.hbm [shape: f32[8,128], index: 0, kind: input, shape index: {}]   ;;  %s1296_s1 = inlined_call_operand.hbm [shape: f32[8,128], index: 1, kind: input, shape index: {}]   ;;  %s1297_s2 = inlined_call_operand.hbm [shape: f32[2,10,8,128], index: 2, kind: output, shape index: {0}]   ;;  %s1298_s3 = inlined_call_operand.hbm [shape: f32[2,10,8,128], index: 3, kind: output, shape index: {1}]  }
   0x1   :  { %11 = vsyncpa [#allocation3 + $0x1], 0 }
   0x2   :  { %12 = vsyncpa [#allocation6], 0 }
   0x3   :  { %14 = vsyncpa [#allocation6 + $0x1], 0 }
   0x4   :  { %15 = vsyncpa [#allocation4], 0 }
   0x5   :  { %17 = vsyncpa [#allocation4 + $0x1], 0 }
   0x6   :  { %18 = vsyncpa [#allocation9], 0 }
   0x7   :  { %20 = vsyncpa [#allocation9 + $0x1], 0  ;;  %s1024_s12 = smov 0   ;;  %s1026_s13 = smov 0  }
   0x8   :  { %s1028_s14 = smov 0   ;;  %s1030_s15 = smov 0  }
   0x9   :  { %s1032_s16 = smov 0   ;;  %s1034_s17 = smov 0  }
   0xa   :  { %s1036_s18 = smov 0   ;;  %s1038_s19 = smov 0  }
   0xb LB: > { %s634_s20 = sadd.s32 4294967295, %s995_s19   ;;  %s635_s21 = sadd.s32 4294967294, %s995_s19   ;;  %s995_s19 = sphi %s1038_s19, %s26_s19   ;;  %s991_s18 = sphi %s1036_s18, %s1319_s18   ;;  %s987_s17 = sphi %s1034_s17, %s1318_s17   ;;  %s983_s16 = sphi %s1032_s16, %s1285_s16   ;;  %s979_s15 = sphi %s1030_s15, %s1317_s15   ;;  %s975_s14 = sphi %s1028_s14, %s1316_s14   ;;  %s971_s13 = sphi %s1026_s13, %s1315_s13   ;;  %s967_s12 = sphi %s1024_s12, %s1314_s12  }
   0xc   : > { %s38_s22 = sadd.s32 1, %s991_s18  ;;  %p964_p1 = scmp.ne.s32.totalorder %s983_s16, 0 }
   0xd   : > { %p40_p0 = scmp.ge.s32.totalorder %s38_s22, 2  ;;  %p59_p2 = scmp.eq.s32.totalorder %s995_s19, 0 }
   0xe   : > { %p64_p3 = scmp.ne.s32.totalorder %s983_s16, %s979_s15  ;;  %p65_p5 = scmp.eq.s32.totalorder %s634_s20, 0 }
   0xf   : > { %s1321_s22 = smov (%p40_p0, %s38_s22), 0  ;;  %p1070_p4 = por %p964_p1, %p59_p2 }
  0x10   : > { %p1074_p6 = por %p65_p5, %p64_p3  ;;  %s106_s25 = ssub.s32 %s991_s18, %s1321_s22 }
  0x11   : > { %p107_p7 = scmp.eq.s32.totalorder %s106_s25, 0  ;;  %s109_s26 = sadd.s32 1, %s975_s14 }
  0x12   : > { %s1302_s24 = scalar_select %p1074_p6, 1, 0 }
  0x13   : > { %s1082_s27 = scalar_select %p107_p7, %s975_s14, %s109_s26  }
  0x14   : > { %p119_p8 = scmp.ne.s32.totalorder %s975_s14, %s971_s13  ;;  %p120_p9 = scmp.eq.s32.totalorder %s634_s20, 1 }
  0x15   : > { %p125_p10 = scmp.ne.s32.totalorder %s971_s13, %s967_s12  ;;  %p126_p11 = scmp.eq.s32.totalorder %s635_s21, 1 }
  0x16   : > { %p1088_p12 = por %p120_p9, %p119_p8  ;;  %p713_p1 = scmp.lt.s32.totalorder %s995_s19, 2 }
  0x17   : > { %p1093_p0 = por %p126_p11, %p125_p10  ;;  %s997_s30 = smov [#allocation2]  }
  0x18   : > { %s1303_s28 = scalar_select %p1088_p12, 1, 0 }
  0x19   : > { %s1304_s29 = scalar_select %p1093_p0, 1, 0 }
  0x1a   : > { %s186_s4 = sshll.u32 %s997_s30, 4  ;;  %p1100_p2 = pnand %p713_p1, %p1070_p4  ;;  %s187_s4 = int_to_ptr.vmem [resolvable:$true] %s186_s4 }
  0x1b   : > { %s796_s8 = scalar_lea.hbm %s1295_s0, 128 }
  0x1c   : > { %p797_p7 = scmp.ne.s32.totalorder %s1295_s0, %s796_s8  ;;  %p798_p8 = pneg %p1100_p2 }
  0x1d   : > { %p803_p10 = scmp.lt.u32.totalorder %s796_s8, %s796_s8  ;;  %p805_p11 = scmp.lt.u32.totalorder %s796_s8, %s1295_s0 }
  0x1e   : > { %p799_p4 = pnand %p798_p8, %p797_p7 }
  0x1f   : > { %p806_p1 = por %p805_p11, %p803_p10 }
  0x20   : > { %p800_p9 = pneg %p799_p4 }
  0x22   : > { %p807_p13 = pnand %p806_p1, %p800_p9 }
  0x24   : > { %810 = shalt.err (!%p807_p13)
}
  0x25   : > { %s811_s20 = scalar_lea.vmem %s187_s4, 128  ;;  %s818_s21 = scalar_lea.vmem %s187_s4, 256 }
  0x26   : > { %p812_p3 = scmp.ne.s32.totalorder %s187_s4, %s811_s20  ;;  %p819_p12 = scmp.lt.s32.totalorder %s187_s4, %s187_s4 }
  0x27   : > { %p820_p6 = scmp.lt.s32.totalorder %s818_s21, %s811_s20 }
  0x28   : > { %p814_p5 = pnand %p812_p3, %p798_p8 }
  0x29   : > { %p821_p7 = por %p820_p6, %p819_p12 }
  0x2a   : > { %p815_p0 = pneg %p814_p5 }
  0x2c   : > { %p822_p4 = pnand %p821_p7, %p815_p0 }
  0x2e   : > { %825 = shalt.err (!%p822_p4)
}
  0x2f   : > { %702 = dma.hbm_to_vmem [thread:$0]  (!%p1100_p2), %s1295_s0, 128, %s187_s4, [#allocation3]  }
  0x30   : > { %p1306_p13 = scmp.lt.s32.totalorder %s995_s19, 3  ;;  %p1307_p9 = scmp.ge.s32.totalorder %s995_s19, 1 }
  0x31   : > { %s998_s30 = smov [#allocation5]   ;;  %s826_s9 = scalar_lea.hbm %s1296_s1, 128 }
  0x32   : > { %p1132_p10 = pnand %p1307_p9, %p1306_p13  ;;  %s207_s6 = sshll.u32 %s998_s30, 4  ;;  %s208_s6 = int_to_ptr.vmem [resolvable:$true] %s207_s6 }
  0x33   : > { %p827_p6 = scmp.ne.s32.totalorder %s1296_s1, %s826_s9  ;;  %p833_p3 = scmp.lt.u32.totalorder %s826_s9, %s826_s9 }
  0x34   : > { %s1308_s26 = scalar_select %p1132_p10, 1, 0 }
  0x35   : > { %p829_p12 = pnand %p827_p6, %p798_p8  ;;  %p835_p5 = scmp.lt.u32.totalorder %s826_s9, %s1296_s1 }
  0x37   : > { %p830_p0 = pneg %p829_p12  ;;  %p836_p11 = por %p835_p5, %p833_p3 }
  0x39   : > { %p837_p1 = pnand %p836_p11, %p830_p0 }
  0x3b   : > { %840 = shalt.err (!%p837_p1)
}
  0x3c   : > { %s841_s20 = scalar_lea.vmem %s208_s6, 128  ;;  %s848_s21 = scalar_lea.vmem %s208_s6, 256 }
  0x3d   : > { %p842_p7 = scmp.ne.s32.totalorder %s208_s6, %s841_s20  ;;  %p849_p9 = scmp.lt.s32.totalorder %s208_s6, %s208_s6 }
  0x3e   : > { %p850_p10 = scmp.lt.s32.totalorder %s848_s21, %s841_s20 }
  0x3f   : > { %p844_p4 = pnand %p842_p7, %p798_p8 }
  0x40   : > { %p851_p6 = por %p850_p10, %p849_p9 }
  0x41   : > { %p845_p13 = pneg %p844_p4 }
  0x43   : > { %p852_p12 = pnand %p851_p6, %p845_p13 }
  0x45   : > { %855 = shalt.err (!%p852_p12)
}
  0x46   : > { %705 = dma.hbm_to_vmem [thread:$0]  (!%p1100_p2), %s1296_s1, 128, %s208_s6, [#allocation6]  }
  0x47   : > { %p1309_p0 = scmp.ne.s32.totalorder %s1308_s26, 0 }
  0x48   : > { %s218_s30 = sand.u32 (!%p1309_p0), 1, %s983_s16   ;;  %p1310_p8 = scmp.ne.s32.totalorder (!%p1309_p0), %s1302_s24, 0 }
  0x49   : > { %216 = sbr.rel (%p1309_p0) target bundleno = 176 (0xb0), region = 28  ;;  %s643_s7 = sshll.u32 (!%p1309_p0), %s218_s30, 3 }
  0x4a   : > { %s219_s8 = scalar_lea.sflag (!%p1309_p0), [#allocation3], %s218_s30  ;;  %s222_s9 = scalar_lea.vmem (!%p1309_p0), [#allocation2], %s643_s7 }
  0x50   : > { %949 = dma.done.wait (%p1310_p8), %s219_s8, 128  }
  0x51   : > { %951 = vsyncadd (%p1310_p8), %s219_s8, 4294967168  ;;  %s228_s5 = scalar_lea.sflag [#allocation6], %s218_s30  ;;  %s231_s10 = scalar_lea.vmem [#allocation5], %s643_s7 }
  0x52   : > { %953 = dma.done.wait (%p1310_p8), %s228_s5, 128  }
  0x53   : > { %955 = vsyncadd (%p1310_p8), %s228_s5, 4294967168  ;;  %v303_v0 = vld [vmem:[%s222_s9] sm:$0xff]  ;;  %v297_v6 = vlaneseq  ;;  %v304_v12 = vld [vmem:[%s231_s10] sm:$0xff]  ;;  %s645_s24 = sshll.u32 %s987_s17, 10  ;;  %s1169_s6 = sand.u32 1, %s971_s13   ;;  %v999_v34 = vmov 0.0  }
  0x54   : > { %v305_v1 = vand.u32 2147483647, %v303_v0  ;;  %vm309_vm0 = vcmp.ge.f32.partialorder %v303_v0, 0.0  ;;  %v316_v14 = vmax.f32 %v303_v0, 0.0  ;;  %v317_v15 = vmul.f32 %v304_v12, %v303_v0  ;;  %s296_s26 = ssub.s32 256, %s645_s24  ;;  %s686_s11 = smul.u32 80, %s1169_s6 }
  0x55   : > { %v298_v8 = vshrl.u32 %v297_v6, 7  ;;  %v301_v18 = vand.u32 127, %v297_v6  ;;  %v331_v27 = vstv %s296_s26  ;;  %s689_s20 = smul.u32 1280, %s987_s17  ;;  %s464_s5 = scalar_lea.sflag [#allocation4], %s1169_s6 }
  0x56   : > { %v306_v2 = vsub.f32 0.0, %v305_v1  ;;  %v318_v23 = vsub.f32 %v316_v14, %v317_v15  ;;  %s1172_s4 = scalar_lea.vmem [#allocation7], %s686_s11  ;;  %s1175_s15 = scalar_lea.vmem [#allocation8], %s686_s11 }
  0x57   : > { %v299_v17 = vmul.u32 128, %v298_v8  ;;  %s482_s21 = sshll.u32 %s1172_s4, 4  ;;  %s1193_s17 = scalar_lea.hbm %s1297_s2, %s689_s20  ;;  %s1200_s21 = int_to_ptr.vmem [resolvable:$true] %s482_s21 }
  0x58   : > { %v307_v3 = vmul.f32 1.442695, %v306_v2  ;;  %s498_s30 = sshll.u32 %s1175_s15, 4  ;;  %s1205_s9 = scalar_lea.hbm %s1298_s3, %s689_s20  ;;  %s1207_s30 = int_to_ptr.vmem [resolvable:$true] %s498_s30 }
  0x59   : > { %v302_v24 = vadd.s32 %v301_v18, %v299_v17  ;;  %s856_s10 = scalar_lea.vmem %s1200_s21, 1280  ;;  %p1311_p10 = scmp.ne.s32.totalorder %s1303_s28, 0 }
  0x5a   : > { %790 = vpow2.f32 %v307_v3  ;;  %p857_p2 = scmp.ne.s32.totalorder %s1200_s21, %s856_s10  ;;  %s1000_s24 = smov [#allocation7]  }
  0x5b   : > { %vm332_vm2 = vcmp.lt.s32.totalorder %v302_v24, %v331_v27  ;;  %s860_s26 = sshll.u32 %s1000_s24, 4  ;;  %s861_s26 = int_to_ptr.vmem [resolvable:$false] %s860_s26 }
  0x5c   : > { %p858_p3 = pnand %p857_p2, %p1311_p10  ;;  %s862_s11 = scalar_lea.vmem %s861_s26, 2560 }
  0x5d   : > { %p863_p11 = scmp.lt.s32.totalorder %s1200_s21, %s861_s26  ;;  %p864_p1 = scmp.lt.s32.totalorder %s862_s11, %s856_s10 }
  0x5e   : > { %p859_p5 = pneg %p858_p3 }
  0x5f   : > { %p865_p7 = por %p864_p1, %p863_p11 }
  0x61   : > { %p866_p4 = pnand %p865_p7, %p859_p5 }
  0x64   : > { %v791_v4 = vpop.eup %790 }
  0x65   : > { %v311_v5 = vadd.f32 1.0, %v791_v4  ;;  %v322_v7 = vmul.f32 -0.5, %v791_v4  ;;  %v310_v10 = vsel %vm309_vm0, 1.0, %v791_v4  ;;  %v325_v11 = vand.u32 2147483647, %v791_v4 }
  0x67   : > { %792 = vrcp.f32 %v311_v5  ;;  %v323_v9 = vadd.f32 1.0, %v322_v7  ;;  %vm326_vm1 = vcmp.lt.f32.partialorder %v325_v11, 0.0004427343 }
  0x68   : > { %794 = vlog2.f32 %v311_v5 }
  0x69   : > { %v324_v20 = vmul.f32 %v791_v4, %v323_v9 }
  0x71   : > { %v793_v13 = vpop.eup %792 }
  0x72   : > { %v795_v16 = vpop.eup %794  ;;  %v313_v19 = vmul.f32 %v793_v13, %v310_v10 }
  0x73   : > { %v321_v21 = vmul.f32 0.6931472, %v795_v16 }
  0x74   : > { %v314_v22 = vsub.f32 %v313_v19, %v304_v12 }
  0x75   : > { %v327_v26 = vsel %vm326_vm1, %v324_v20, %v321_v21 }
  0x76   : > { %v315_v25 = vand.u32 2147483647, %v314_v22  ;;  %v328_v29 = vadd.f32 %v327_v26, %v318_v23 }
  0x78   : > { %v329_v28 = vmul.f32 9.9999, %v315_v25  ;;  %v334_v32 = vsel %vm332_vm2, %v328_v29, 0.0 }
  0x7a   : > { %v687_v30 = vtrunc.f32 %v329_v28 }
  0x7c   : > { %v688_v31 = vcvt.f32.s32 %v687_v30 }
  0x7e   : > { %v333_v33 = vsel %vm332_vm2, %v688_v31, 4294967295 }
  0x7f   : > { %vm335_vm3 = vcmp.eq.s32.totalorder %v333_v33, 0  ;;  %vm340_vm4 = vcmp.eq.s32.totalorder %v333_v33, 1  ;;  %vm345_vm5 = vcmp.eq.s32.totalorder %v333_v33, 2  ;;  %vm350_vm6 = vcmp.eq.s32.totalorder %v333_v33, 3 }
  0x80   : > { %v336_v35 = vsel %vm335_vm3, 1.0, %v999_v34  ;;  %v338_v36 = vsel %vm335_vm3, %v334_v32, 0.0  ;;  %v341_v37 = vsel %vm340_vm4, 1.0, %v999_v34  ;;  %v343_v38 = vsel %vm340_vm4, %v334_v32, 0.0 }
  0x81   : > { %v346_v39 = vsel %vm345_vm5, 1.0, %v999_v34  ;;  %v348_v40 = vsel %vm345_vm5, %v334_v32, 0.0  ;;  %v351_v41 = vsel %vm350_vm6, 1.0, %v999_v34  ;;  %v353_v42 = vsel %vm350_vm6, %v334_v32, 0.0  ;;  %387 = vst [vmem:[%s1172_s4] sm:$0xff] %v336_v35  ;;  %390 = vst [vmem:[%s1175_s15] sm:$0xff] %v338_v36 }
  0x82   : > { %647 = vst [vmem:[%s1172_s4 + $0x8] sm:$0xff] %v341_v37  ;;  %649 = vst [vmem:[%s1175_s15 + $0x8] sm:$0xff] %v343_v38  ;;  %vm355_vm7 = vcmp.eq.s32.totalorder %v333_v33, 4  ;;  %vm360_vm8 = vcmp.eq.s32.totalorder %v333_v33, 5  ;;  %vm365_vm9 = vcmp.eq.s32.totalorder %v333_v33, 6  ;;  %vm370_vm10 = vcmp.eq.s32.totalorder %v333_v33, 7 }
  0x83   : > { %651 = vst [vmem:[%s1172_s4 + $0x10] sm:$0xff] %v346_v39  ;;  %653 = vst [vmem:[%s1175_s15 + $0x10] sm:$0xff] %v348_v40  ;;  %v356_v43 = vsel %vm355_vm7, 1.0, %v999_v34  ;;  %v358_v44 = vsel %vm355_vm7, %v334_v32, 0.0  ;;  %v361_v45 = vsel %vm360_vm8, 1.0, %v999_v34  ;;  %v363_v46 = vsel %vm360_vm8, %v334_v32, 0.0 }
  0x84   : > { %655 = vst [vmem:[%s1172_s4 + $0x18] sm:$0xff] %v351_v41  ;;  %657 = vst [vmem:[%s1175_s15 + $0x18] sm:$0xff] %v353_v42  ;;  %v366_v47 = vsel %vm365_vm9, 1.0, %v999_v34  ;;  %v368_v48 = vsel %vm365_vm9, %v334_v32, 0.0  ;;  %v371_v49 = vsel %vm370_vm10, 1.0, %v999_v34  ;;  %v373_v50 = vsel %vm370_vm10, %v334_v32, 0.0 }
  0x85   : > { %659 = vst [vmem:[%s1172_s4 + $0x20] sm:$0xff] %v356_v43  ;;  %661 = vst [vmem:[%s1175_s15 + $0x20] sm:$0xff] %v358_v44  ;;  %vm375_vm11 = vcmp.eq.s32.totalorder %v333_v33, 8  ;;  %vm380_vm12 = vcmp.eq.s32.totalorder %v333_v33, 9 }
  0x86   : > { %663 = vst [vmem:[%s1172_s4 + $0x28] sm:$0xff] %v361_v45  ;;  %665 = vst [vmem:[%s1175_s15 + $0x28] sm:$0xff] %v363_v46  ;;  %v376_v51 = vsel %vm375_vm11, 1.0, %v999_v34  ;;  %v378_v52 = vsel %vm375_vm11, %v334_v32, 0.0  ;;  %v381_v53 = vsel %vm380_vm12, 1.0, %v999_v34  ;;  %v383_v54 = vsel %vm380_vm12, %v334_v32, 0.0 }
  0x87   : > { %667 = vst [vmem:[%s1172_s4 + $0x30] sm:$0xff] %v366_v47  ;;  %669 = vst [vmem:[%s1175_s15 + $0x30] sm:$0xff] %v368_v48 }
  0x88   : > { %671 = vst [vmem:[%s1172_s4 + $0x38] sm:$0xff] %v371_v49  ;;  %673 = vst [vmem:[%s1175_s15 + $0x38] sm:$0xff] %v373_v50 }
  0x89   : > { %675 = vst [vmem:[%s1172_s4 + $0x40] sm:$0xff] %v376_v51  ;;  %677 = vst [vmem:[%s1175_s15 + $0x40] sm:$0xff] %v378_v52 }
  0x8a   : > { %679 = vst [vmem:[%s1172_s4 + $0x48] sm:$0xff] %v381_v53  ;;  %681 = vst [vmem:[%s1175_s15 + $0x48] sm:$0xff] %v383_v54 }
  0x8b   : > { %869 = shalt.err (!%p866_p4)
}
  0x8c   : > { %s870_s4 = scalar_lea.hbm %s1193_s17, 1280  ;;  %s874_s23 = scalar_lea.hbm %s1297_s2, 2560 }
  0x8d   : > { %p871_p13 = scmp.ne.s32.totalorder %s1193_s17, %s870_s4  ;;  %p875_p12 = scmp.lt.u32.totalorder %s1193_s17, %s1297_s2 }
  0x8e   : > { %p876_p0 = scmp.lt.u32.totalorder %s874_s23, %s870_s4  ;;  %p878_p2 = scmp.lt.u32.totalorder %s870_s4, %s1193_s17 }
  0x8f   : > { %p872_p9 = pnand %p871_p13, %p1311_p10 }
  0x90   : > { %p877_p8 = por %p876_p0, %p875_p12 }
  0x91   : > { %p873_p6 = pneg %p872_p9 }
  0x92   : > { %p879_p3 = por %p878_p2, %p877_p8 }
  0x94   : > { %p880_p5 = pnand %p879_p3, %p873_p6 }
  0x96   : > { %883 = shalt.err (!%p880_p5)
}
  0x97   : > { %s1001_s8 = smov 128   ;;  %s1002_s10 = smov 8  }
  0x98   : > { %695 = dma.vmem_to_hbm [thread:$0]  (%p1311_p10), %s1200_s21, 1280, %s1193_s17, %s464_s5, %s1001_s8, %s1001_s8, %s1002_s10  }
  0x99   : > { %s469_s24 = scalar_lea.sflag [#allocation9], %s1169_s6  ;;  %s884_s26 = scalar_lea.vmem %s1207_s30, 1280 }
  0x9a   : > { %p885_p11 = scmp.ne.s32.totalorder %s1207_s30, %s884_s26  ;;  %s1003_s11 = smov [#allocation8]  }
  0x9b   : > { %s888_s4 = sshll.u32 %s1003_s11, 4  ;;  %s889_s4 = int_to_ptr.vmem [resolvable:$false] %s888_s4 }
  0x9c   : > { %p886_p1 = pnand %p885_p11, %p1311_p10  ;;  %s890_s15 = scalar_lea.vmem %s889_s4, 2560 }
  0x9d   : > { %p891_p4 = scmp.lt.s32.totalorder %s1207_s30, %s889_s4  ;;  %p892_p13 = scmp.lt.s32.totalorder %s890_s15, %s884_s26 }
  0x9e   : > { %p887_p7 = pneg %p886_p1 }
  0x9f   : > { %p893_p9 = por %p892_p13, %p891_p4 }
  0xa1   : > { %p894_p6 = pnand %p893_p9, %p887_p7 }
  0xa3   : > { %897 = shalt.err (!%p894_p6)
}
  0xa4   : > { %s898_s21 = scalar_lea.hbm %s1205_s9, 1280  ;;  %s902_s20 = scalar_lea.hbm %s1298_s3, 2560 }
  0xa5   : > { %p899_p12 = scmp.ne.s32.totalorder %s1205_s9, %s898_s21  ;;  %p903_p2 = scmp.lt.u32.totalorder %s1205_s9, %s1298_s3 }
  0xa6   : > { %p904_p3 = scmp.lt.u32.totalorder %s902_s20, %s898_s21  ;;  %p906_p11 = scmp.lt.u32.totalorder %s898_s21, %s1205_s9 }
  0xa7   : > { %p900_p0 = pnand %p899_p12, %p1311_p10 }
  0xa8   : > { %p905_p5 = por %p904_p3, %p903_p2 }
  0xa9   : > { %p901_p8 = pneg %p900_p0 }
  0xaa   : > { %p907_p1 = por %p906_p11, %p905_p5 }
  0xac   : > { %p908_p7 = pnand %p907_p1, %p901_p8 }
  0xae   : > { %911 = shalt.err (!%p908_p7)
}
  0xaf   : > { %696 = dma.vmem_to_hbm [thread:$0]  (%p1311_p10), %s1207_s30, 1280, %s1205_s9, %s469_s24, %s1001_s8, %s1001_s8, %s1002_s10  }
  0xb0 PF: > { %s513_s7 = sand.u32 1, %s967_s12   ;;  %p1312_p4 = scmp.ne.s32.totalorder %s1304_s29, 0 }
  0xb1   : > { %p1313_p13 = scmp.ge.s32.totalorder %s995_s19, 2  ;;  %s514_s26 = scalar_lea.sflag [#allocation4], %s513_s7 }
  0xb3   : > { %p707_p9 = pnand %p1313_p13, %p1312_p4 }
  0xb5   : > { %957 = dma.done.wait (!%p707_p9), %s514_s26, 1280  }
  0xb6   : > { %959 = vsyncadd (!%p707_p9), %s514_s26, 4294966016  ;;  %s523_s28 = scalar_lea.sflag [#allocation9], %s513_s7 }
  0xb7   : > { %961 = dma.done.wait (!%p707_p9), %s523_s28, 1280  }
  0xb8   : > { %963 = vsyncadd (!%p707_p9), %s523_s28, 4294966016  ;;  %s26_s19 = sadd.s32 1, %s995_s19   ;;  %s1314_s12 = smov %s971_s13 }
  0xb9   : > { %p23_p6 = scmp.ge.s32.totalorder %s26_s19, 4   ;;  %s1315_s13 = smov %s975_s14 }
  0xba   : > { %s1316_s14 = smov %s1082_s27  ;;  %s1317_s15 = smov %s983_s16 }
  0xbb   : > { %s1285_s16 = smov 0   ;;  %s1318_s17 = smov %s991_s18 }
  0xbc   : > { %s1319_s18 = smov %s1321_s22  ;;  %25 = sbr.rel (!%p23_p6) target bundleno = 11 (0xb), region = 125 }
  0xc3   :  { %528 = vsyncpa [#allocation3], 1 }
  0xc4   :  { %530 = vsyncpa [#allocation3 + $0x1], 1 }
  0xc5   :  { %531 = vsyncpa [#allocation6], 1 }
  0xc6   :  { %533 = vsyncpa [#allocation6 + $0x1], 1 }
  0xc7   :  { %534 = vsyncpa [#allocation4], 1 }
  0xc8   :  { %536 = vsyncpa [#allocation4 + $0x1], 1 }
  0xc9   :  { %537 = vsyncpa [#allocation9], 1 }
  0xca   :  { %539 = vsyncpa [#allocation9 + $0x1], 1 }

</bundles_post_ra>
